<compile_context>
chip_gen: v7x
topology: tpu7x:2x2x1
jax: 0.10.0
libtpu: 0.0.40
codegen_flags: <defaults>
</compile_context>

<pallas_src>
import functools

import jax
import jax.numpy as jnp
from jax.experimental import pallas as pl
from jax.experimental.pallas import tpu as pltpu


def affinity_loss_kernel(labels_ref, x_ref, centers_ref, loss_ref,
                         var_ref, acc_ref, *, hw, batch, num_class, tile_b):
    # labels_ref : (Bp,)          int32   SMEM (scalar prefetch)
    # x_ref      : (tile_b,C,HWp) float32 VMEM block (streamed over the grid)
    # centers_ref: (NC,1,C)       float32 VMEM (resident, constant index map)
    # loss_ref   : (1,1)          float32 SMEM output
    # var_ref    : (1,)           float32 SMEM scratch (hoisted centers variance)
    # acc_ref    : (1,)           float32 SMEM scratch (loss accumulator)
    pid = pl.program_id(0)

    @pl.when(pid == 0)
    def _init():
        acc_ref[0] = jnp.float32(0.0)
        c = centers_ref[...].astype(jnp.float32)               # (NC, 1, C)
        c_mean = jnp.mean(c, axis=0, keepdims=True)            # (1, 1, C)
        # torch.var(dim=0) is unbiased (ddof=1); guard the degenerate NC==1 case.
        denom = jnp.float32(max(num_class - 1, 1))
        var_ref[0] = jnp.sum((c - c_mean) * (c - c_mean)) / denom

    # ---- Global average pool over the spatial axis -------------------------
    # VPU-accumulate 128-lane chunks, then a single cross-lane reduce per
    # (tile_b, C, 128) slab.  Zero padding beyond the true HW contributes 0.
    hwp = x_ref.shape[2]
    nchunk = hwp // 128
    s = x_ref[:, :, 0:128]
    for k in range(1, nchunk):
        s = s + x_ref[:, :, k * 128:(k + 1) * 128]
    xbar = jnp.sum(s, axis=-1) * jnp.float32(1.0 / hw)          # (tile_b, C)

    inv_var = 1.0 / var_ref[0]
    # Clamp floor picked up by the (num_class - 1) masked-out (zeroed) columns
    # of each row (matches clamp-after-mask in the reference module).
    floor_extra = jnp.float32((num_class - 1) * 1e-12)

    partial = jnp.float32(0.0)
    base = pid * tile_b
    for i in range(tile_b):                                     # static unroll, small
        row = base + i
        li = labels_ref[row]                                    # int32 scalar (SMEM)
        ci = centers_ref[li]                                    # (1, C) gathered center
        diff = xbar[i:i + 1, :] - ci                            # (1, C)
        d = jnp.sum(diff * diff) * inv_var
        d = jnp.clip(d, 1e-12, 1e12)                            # clamp(min=1e-12, max=1e12)
        valid = row < batch                                     # mask padded batch rows
        partial = partial + jnp.where(valid, d + floor_extra, jnp.float32(0.0))

    acc_ref[0] = acc_ref[0] + partial

    @pl.when(pid == pl.num_programs(0) - 1)
    def _finalize():
        loss_ref[0, 0] = acc_ref[0] / jnp.float32(batch)


def _auto_tile_b(batch, row_bytes, budget_bytes=4 << 20, cap=32):
    """Largest batch-tile whose streamed x block stays under ~4 MiB."""
    tb = budget_bytes // max(row_bytes, 1)
    return int(max(1, min(batch, cap, tb)))


def affinity_loss(x, labels, centers, *, tile_b=None):
    """x: (B, C, H, W) float32, labels: (B,) int, centers: (num_class, C) float32."""
    B, C, H, W = x.shape
    NC, FD = centers.shape
    assert FD == C, "feat_dim of centers must match channel dim of x"
    HW = H * W
    HWp = ((HW + 127) // 128) * 128                     # lane-dense last dim

    x_flat = x.reshape(B, C, HW).astype(jnp.float32)
    if HWp != HW:
        x_flat = jnp.pad(x_flat, ((0, 0), (0, 0), (0, HWp - HW)))

    if tile_b is None:
        tile_b = _auto_tile_b(B, C * HWp * 4)
    tile_b = int(max(1, min(tile_b, B)))
    grid = pl.cdiv(B, tile_b)
    Bp = grid * tile_b
    if Bp != B:
        x_flat = jnp.pad(x_flat, ((0, Bp - B), (0, 0), (0, 0)))
        labels_p = jnp.pad(labels.astype(jnp.int32), (0, Bp - B))
    else:
        labels_p = labels.astype(jnp.int32)

    # Centers as (NC, 1, C): dynamic gather of a center row indexes the leading
    # (non-layout) axis, the well-supported dynamic-index pattern.
    centers3 = centers.astype(jnp.float32).reshape(NC, 1, C)

    kernel = functools.partial(affinity_loss_kernel,
                               hw=HW, batch=B, num_class=NC, tile_b=tile_b)

    grid_spec = pltpu.PrefetchScalarGridSpec(
        num_scalar_prefetch=1,                           # labels -> SMEM
        grid=(grid,),
        in_specs=[
            pl.BlockSpec((tile_b, C, HWp), lambda i, lbl: (i, 0, 0)),   # x (streamed)
            pl.BlockSpec((NC, 1, C), lambda i, lbl: (0, 0, 0)),         # centers (resident)
        ],
        out_specs=pl.BlockSpec(memory_space=pltpu.SMEM),                # scalar loss
        scratch_shapes=[
            pltpu.SMEM((1,), jnp.float32),               # hoisted centers variance
            pltpu.SMEM((1,), jnp.float32),               # loss accumulator
        ],
    )

    out = pl.pallas_call(
        kernel,
        out_shape=jax.ShapeDtypeStruct((1, 1), jnp.float32),
        grid_spec=grid_spec,
        compiler_params=pltpu.CompilerParams(
            dimension_semantics=("arbitrary",),          # scalar accumulation across B tiles
            vmem_limit_bytes=32 * 1024 * 1024,
        ),
    )(labels_p, x_flat, centers3)
    return out[0, 0]


def affinity_loss_reference(x, labels, centers):
    """Pure-JAX reference mirroring the PyTorch module."""
    B = x.shape[0]
    NC = centers.shape[0]
    xg = jnp.mean(x, axis=(2, 3))                                # AdaptiveAvgPool2d(1) + view
    distmat = (jnp.sum(xg ** 2, axis=1, keepdims=True)
               + jnp.sum(centers ** 2, axis=1)[None, :]
               - 2.0 * xg @ centers.T)
    mask = (labels[:, None] == jnp.arange(NC)[None, :]).astype(jnp.float32)
    var_sum = jnp.sum(jnp.var(centers, axis=0, ddof=1))
    dist = distmat * mask / var_sum
    return jnp.sum(jnp.clip(dist, 1e-12, 1e12)) / B


if __name__ == "__main__":
    # Small shapes consistent with the module (num_class=8); B=5 with tile_b=2
    # exercises the multi-step grid and batch padding, H=W=10 exercises the
    # lane padding of the spatial axis (100 -> 128).
    B, FEAT_DIM, H, W = 5, 32, 10, 10
    NUM_CLASS = 8

    key = jax.random.PRNGKey(0)
    kx, kl, kc = jax.random.split(key, 3)
    x = jax.random.normal(kx, (B, FEAT_DIM, H, W), dtype=jnp.float32)
    labels = jax.random.randint(kl, (B,), 0, NUM_CLASS, dtype=jnp.int32)
    # Deterministic "randn" init of the centers parameter (num_class, feat_dim).
    centers = jax.random.normal(kc, (NUM_CLASS, FEAT_DIM), dtype=jnp.float32)

    loss = jax.block_until_ready(affinity_loss(x, labels, centers, tile_b=2))
    ref = jax.block_until_ready(affinity_loss_reference(x, labels, centers))

    assert jnp.allclose(loss, ref, rtol=1e-5, atol=1e-5), (loss, ref)
    print("KERNEL_OK")
</pallas_src>

<mosaic_0001>
module attributes {stable_mosaic.version = 11 : i64} {
  func.func @affinity_loss_kernel(%arg0: i32, %arg1: memref<6xi32, #tpu.memory_space<smem>>, %arg2: memref<2x32x128xf32, #tpu.memory_space<vmem>>, %arg3: memref<8x1x32xf32, #tpu.memory_space<vmem>>, %arg4: memref<1x1xf32, #tpu.memory_space<smem>>, %arg5: memref<1xf32, #tpu.memory_space<smem>>, %arg6: memref<1xf32, #tpu.memory_space<smem>>) attributes {dimension_semantics = [#tpu.dimension_semantics<arbitrary>], iteration_bounds = array<i64: 3>, scalar_prefetch = 1 : i64, scratch_operands = 2 : i64, tpu.core_type = #tpu.core_type<tc>, window_params = [{transform_indices = @transform_0, window_bounds = array<i64: 2, 32, 128>}, {pipeline_mode = #tpu.pipeline_mode<synchronous>, transform_indices = @transform_1, window_bounds = array<i64: 8, 1, 32>}, {transform_indices = @transform_2, window_bounds = array<i64: 1, 1>}]} {
    %c0_i32 = arith.constant 0 : i32
    %0 = arith.cmpi eq, %arg0, %c0_i32 : i32
    %1 = arith.extui %0 : i1 to i32
    %c0_i32_0 = arith.constant 0 : i32
    %2 = arith.cmpi ne, %1, %c0_i32_0 : i32
    scf.if %2 {
      %cst_27 = arith.constant 0.000000e+00 : f32
      %c0_28 = arith.constant 0 : index
      %56 = memref.load %arg6[%c0_28] : memref<1xf32, #tpu.memory_space<smem>>
      memref.store %cst_27, %arg6[%c0_28] : memref<1xf32, #tpu.memory_space<smem>>
      %c0_29 = arith.constant 0 : index
      %c0_30 = arith.constant 0 : index
      %c0_31 = arith.constant 0 : index
      %57 = vector.load %arg3[%c0_29, %c0_30, %c0_31] : memref<8x1x32xf32, #tpu.memory_space<vmem>>, vector<8x1x32xf32>
      %cst_32 = arith.constant dense<0.000000e+00> : vector<1x32xf32>
      %58 = vector.multi_reduction <add>, %57, %cst_32 [0] : vector<8x1x32xf32> to vector<1x32xf32>
      %59 = vector.shape_cast %58 : vector<1x32xf32> to vector<1x1x32xf32>
      %cst_33 = arith.constant 8.000000e+00 : f32
      %60 = vector.broadcast %cst_33 : f32 to vector<1x1x32xf32>
      %61 = arith.divf %59, %60 : vector<1x1x32xf32>
      %62 = vector.broadcast %61 : vector<1x1x32xf32> to vector<8x1x32xf32>
      %63 = arith.subf %57, %62 : vector<8x1x32xf32>
      %64 = vector.broadcast %61 : vector<1x1x32xf32> to vector<8x1x32xf32>
      %65 = arith.subf %57, %64 : vector<8x1x32xf32>
      %66 = arith.mulf %63, %65 : vector<8x1x32xf32>
      %67 = vector.shape_cast %66 : vector<8x1x32xf32> to vector<1x8x1x32xf32>
      %cst_34 = arith.constant dense<0.000000e+00> : vector<1xf32>
      %68 = vector.multi_reduction <add>, %67, %cst_34 [1, 2, 3] : vector<1x8x1x32xf32> to vector<1xf32>
      %69 = vector.shape_cast %68 : vector<1xf32> to vector<1x1x1x1xf32>
      %70 = vector.extract %69[0, 0, 0, 0] : f32 from vector<1x1x1x1xf32>
      %cst_35 = arith.constant 7.000000e+00 : f32
      %71 = arith.divf %70, %cst_35 : f32
      %c0_36 = arith.constant 0 : index
      %72 = memref.load %arg5[%c0_36] : memref<1xf32, #tpu.memory_space<smem>>
      memref.store %71, %arg5[%c0_36] : memref<1xf32, #tpu.memory_space<smem>>
    } else {
    }
    %c0 = arith.constant 0 : index
    %c0_1 = arith.constant 0 : index
    %c0_2 = arith.constant 0 : index
    %3 = vector.load %arg2[%c0, %c0_1, %c0_2] : memref<2x32x128xf32, #tpu.memory_space<vmem>>, vector<2x32x128xf32>
    %cst = arith.constant dense<0.000000e+00> : vector<2x32xf32>
    %4 = vector.multi_reduction <add>, %3, %cst [2] : vector<2x32x128xf32> to vector<2x32xf32>
    %cst_3 = arith.constant 0.00999999977 : f32
    %5 = vector.broadcast %cst_3 : f32 to vector<2x32xf32>
    %6 = arith.mulf %4, %5 : vector<2x32xf32>
    %c0_4 = arith.constant 0 : index
    %7 = memref.load %arg5[%c0_4] : memref<1xf32, #tpu.memory_space<smem>>
    %cst_5 = arith.constant 1.000000e+00 : f32
    %8 = arith.divf %cst_5, %7 : f32
    %c2_i32 = arith.constant 2 : i32
    %9 = arith.muli %arg0, %c2_i32 : i32
    %c0_i32_6 = arith.constant 0 : i32
    %10 = arith.addi %9, %c0_i32_6 : i32
    %11 = arith.index_cast %10 : i32 to index
    %12 = memref.load %arg1[%11] : memref<6xi32, #tpu.memory_space<smem>>
    %13 = arith.index_cast %12 : i32 to index
    %c0_7 = arith.constant 0 : index
    %c0_8 = arith.constant 0 : index
    %14 = vector.load %arg3[%13, %c0_7, %c0_8] : memref<8x1x32xf32, #tpu.memory_space<vmem>>, vector<1x1x32xf32>
    %15 = vector.shape_cast %14 : vector<1x1x32xf32> to vector<1x32xf32>
    %16 = vector.extract_strided_slice %6 {offsets = [0, 0], sizes = [1, 32], strides = [1, 1]} : vector<2x32xf32> to vector<1x32xf32>
    %17 = arith.subf %16, %15 : vector<1x32xf32>
    %18 = arith.mulf %17, %17 : vector<1x32xf32>
    %19 = vector.shape_cast %18 : vector<1x32xf32> to vector<1x1x32xf32>
    %cst_9 = arith.constant dense<0.000000e+00> : vector<1xf32>
    %20 = vector.multi_reduction <add>, %19, %cst_9 [1, 2] : vector<1x1x32xf32> to vector<1xf32>
    %21 = vector.shape_cast %20 : vector<1xf32> to vector<1x1x1xf32>
    %22 = vector.extract %21[0, 0, 0] : f32 from vector<1x1x1xf32>
    %23 = arith.mulf %22, %8 : f32
    %cst_10 = arith.constant 9.99999996E-13 : f32
    %cst_11 = arith.constant 9.99999995E+11 : f32
    %24 = arith.maximumf %cst_10, %23 : f32
    %25 = arith.minimumf %cst_11, %24 : f32
    %c5_i32 = arith.constant 5 : i32
    %26 = arith.cmpi slt, %10, %c5_i32 : i32
    %cst_12 = arith.constant 7.000000e-12 : f32
    %27 = arith.addf %25, %cst_12 : f32
    %cst_13 = arith.constant 0.000000e+00 : f32
    %28 = arith.select %26, %27, %cst_13 : f32
    %cst_14 = arith.constant 0.000000e+00 : f32
    %29 = arith.addf %cst_14, %28 : f32
    %c1_i32 = arith.constant 1 : i32
    %30 = arith.addi %9, %c1_i32 : i32
    %31 = arith.index_cast %30 : i32 to index
    %32 = memref.load %arg1[%31] : memref<6xi32, #tpu.memory_space<smem>>
    %33 = arith.index_cast %32 : i32 to index
    %c0_15 = arith.constant 0 : index
    %c0_16 = arith.constant 0 : index
    %34 = vector.load %arg3[%33, %c0_15, %c0_16] : memref<8x1x32xf32, #tpu.memory_space<vmem>>, vector<1x1x32xf32>
    %35 = vector.shape_cast %34 : vector<1x1x32xf32> to vector<1x32xf32>
    %36 = vector.extract_strided_slice %6 {offsets = [1, 0], sizes = [1, 32], strides = [1, 1]} : vector<2x32xf32> to vector<1x32xf32>
    %37 = arith.subf %36, %35 : vector<1x32xf32>
    %38 = arith.mulf %37, %37 : vector<1x32xf32>
    %39 = vector.shape_cast %38 : vector<1x32xf32> to vector<1x1x32xf32>
    %cst_17 = arith.constant dense<0.000000e+00> : vector<1xf32>
    %40 = vector.multi_reduction <add>, %39, %cst_17 [1, 2] : vector<1x1x32xf32> to vector<1xf32>
    %41 = vector.shape_cast %40 : vector<1xf32> to vector<1x1x1xf32>
    %42 = vector.extract %41[0, 0, 0] : f32 from vector<1x1x1xf32>
    %43 = arith.mulf %42, %8 : f32
    %cst_18 = arith.constant 9.99999996E-13 : f32
    %cst_19 = arith.constant 9.99999995E+11 : f32
    %44 = arith.maximumf %cst_18, %43 : f32
    %45 = arith.minimumf %cst_19, %44 : f32
    %c5_i32_20 = arith.constant 5 : i32
    %46 = arith.cmpi slt, %30, %c5_i32_20 : i32
    %cst_21 = arith.constant 7.000000e-12 : f32
    %47 = arith.addf %45, %cst_21 : f32
    %cst_22 = arith.constant 0.000000e+00 : f32
    %48 = arith.select %46, %47, %cst_22 : f32
    %49 = arith.addf %29, %48 : f32
    %c0_23 = arith.constant 0 : index
    %50 = memref.load %arg6[%c0_23] : memref<1xf32, #tpu.memory_space<smem>>
    %51 = arith.addf %50, %49 : f32
    %c0_24 = arith.constant 0 : index
    %52 = memref.load %arg6[%c0_24] : memref<1xf32, #tpu.memory_space<smem>>
    memref.store %51, %arg6[%c0_24] : memref<1xf32, #tpu.memory_space<smem>>
    %c2_i32_25 = arith.constant 2 : i32
    %53 = arith.cmpi eq, %arg0, %c2_i32_25 : i32
    %54 = arith.extui %53 : i1 to i32
    %c0_i32_26 = arith.constant 0 : i32
    %55 = arith.cmpi ne, %54, %c0_i32_26 : i32
    scf.if %55 {
      %c0_27 = arith.constant 0 : index
      %56 = memref.load %arg6[%c0_27] : memref<1xf32, #tpu.memory_space<smem>>
      %cst_28 = arith.constant 5.000000e+00 : f32
      %57 = arith.divf %56, %cst_28 : f32
      %c0_29 = arith.constant 0 : index
      %c0_30 = arith.constant 0 : index
      %58 = memref.load %arg4[%c0_29, %c0_30] : memref<1x1xf32, #tpu.memory_space<smem>>
      memref.store %57, %arg4[%c0_29, %c0_30] : memref<1x1xf32, #tpu.memory_space<smem>>
    } else {
    }
    return
  }
  func.func @transform_0(%arg0: i32, %arg1: memref<6xi32, #tpu.memory_space<smem>>) -> (i32, i32, i32) {
    %c0_i32 = arith.constant 0 : i32
    %c0_i32_0 = arith.constant 0 : i32
    %c0_i32_1 = arith.constant 0 : i32
    return %arg0, %c0_i32, %c0_i32_0 : i32, i32, i32
  }
  func.func @transform_1(%arg0: i32, %arg1: memref<6xi32, #tpu.memory_space<smem>>) -> (i32, i32, i32) {
    %c0_i32 = arith.constant 0 : i32
    %c0_i32_0 = arith.constant 0 : i32
    %c0_i32_1 = arith.constant 0 : i32
    %c0_i32_2 = arith.constant 0 : i32
    return %c0_i32, %c0_i32_0, %c0_i32_1 : i32, i32, i32
  }
  func.func @transform_2(%arg0: i32, %arg1: memref<6xi32, #tpu.memory_space<smem>>) -> (i32, i32) {
    %c0_i32 = arith.constant 0 : i32
    %c0_i32_0 = arith.constant 0 : i32
    %c0_i32_1 = arith.constant 0 : i32
    return %c0_i32, %c0_i32_0 : i32, i32
  }
}

</mosaic_0001>

<bundles_post_ra>
// kernel: tpu_custom_call.1
= control target key start
LH: loop header
LB: loop body
LE: loop exit
PB: predicated region body
PF: predicated region fallthrough
CT: control target
= control target key end

     0   :  { %s1030_s0 = inlined_call_operand.hbm [shape: s32[6], index: 0, kind: input, shape index: {}]   ;;  %s1031_s1 = inlined_call_operand.hbm [shape: f32[6,32,128], index: 1, kind: input, shape index: {}]   ;;  %s1032_s2 = inlined_call_operand.hbm [shape: f32[8,1,32], index: 2, kind: input, shape index: {}]   ;;  %s1033_s3 = inlined_call_operand.hbm [shape: f32[1,1], index: 3, kind: output, shape index: {}]  }
   0x1   :  { %s657_s14 = scalar_lea.hbm %s1030_s0, 16 }
   0x2   :  { %p658_p0 = scmp.ne.s32.totalorder %s1030_s0, %s657_s14  ;;  %p661_p1 = scmp.lt.u32.totalorder %s657_s14, %s1030_s0 }
   0x4   :  { %p663_p2 = pnand %p661_p1, %p658_p0 }
   0x6   :  { %666 = shalt.err (!%p663_p2)  }
   0x7   :  { %s783_s19 = smov [#allocation5]  }
   0x8   :  { %9 = dma.hbm_to_smem %s1030_s0, 16, %s783_s19, [#allocation4] }
   0x9   :  { %753 = dma.done.wait [#allocation4], 16 }
   0xa   :  { %754 = vsyncadd [#allocation4], 4294967280 }
   0xb   :  { %11 = sfence }
   0xc   :  { %12 = vsyncpa [#allocation7], 0 }
   0xd   :  { %14 = vsyncpa [#allocation7 + $0x1], 0 }
   0xe   :  { %15 = vsyncpa [#allocation10], 0 }
   0xf   :  { %16 = vsyncpa [#allocation8], 0  ;;  %s827_s22 = smov 0   ;;  %s829_s23 = smov 0  }
  0x10   :  { %s831_s24 = smov 0   ;;  %s833_s25 = smov 0  }
  0x11 LB: > { %s846_s0 = sadd.s32 4294967295, %s781_s25   ;;  %p42_p3 = scmp.ne.s32.totalorder %s773_s23, %s769_s22  ;;  %s781_s25 = sphi %s833_s25, %s1049_s25   ;;  %s777_s24 = sphi %s831_s24, %s1048_s24   ;;  %s773_s23 = sphi %s829_s23, %s1047_s23   ;;  %s769_s22 = sphi %s827_s22, %s1046_s22  }
  0x12   : > { %p1034_p4 = scmp.eq.s32.totalorder %s846_s0, 0  ;;  %p555_p5 = scmp.ge.s32.totalorder %s781_s25, 1 }
  0x13   : > { %p95_p6 = scmp.lt.s32.totalorder %s781_s25, 4  ;;  %s784_s28 = smov [#allocation9]  }
  0x14   : > { %p855_p8 = por %p1034_p4, %p42_p3  ;;  %s107_s29 = sshll.u32 %s784_s28, 4  ;;  %s108_s29 = int_to_ptr.vmem [resolvable:$true] %s107_s29 }
  0x15   : > { %p859_p9 = pnand %p555_p5, %p95_p6  ;;  %s872_s4 = sadd.s32 1, %s781_s25  }
  0x16   : > { %s1037_s26 = scalar_select %p855_p8, 1, 0 }
  0x17   : > { %s1038_s27 = scalar_select %p859_p9, 1, 0 }
  0x18   : > { %p596_p10 = pneg %p859_p9  ;;  %s29_s5 = sadd.s32 1, %s777_s24 }
  0x19   : > { %s26_s6 = ssub.s32 %s781_s25, %s872_s4  ;;  %s667_s9 = scalar_lea.hbm %s1032_s2, 128 }
  0x1a   : > { %p867_p11 = pnand %p596_p10, %p1034_p4  ;;  %p668_p12 = scmp.ne.s32.totalorder %s1032_s2, %s667_s9 }
  0x1b   : > { %p674_p2 = scmp.lt.u32.totalorder %s667_s9, %s1032_s2 }
  0x1c   : > { %p669_p13 = pneg %p867_p11 }
  0x1e   : > { %p670_p0 = pnand %p669_p13, %p668_p12 }
  0x20   : > { %p671_p1 = pneg %p670_p0 }
  0x22   : > { %p676_p3 = pnand %p674_p2, %p671_p1 }
  0x24   : > { %679 = shalt.err (!%p676_p3)
}
  0x25   : > { %s680_s14 = scalar_lea.vmem %s108_s29, 128  ;;  %p688_p7 = scmp.lt.s32.totalorder %s108_s29, %s108_s29 }
  0x26   : > { %p681_p5 = scmp.ne.s32.totalorder %s108_s29, %s680_s14  ;;  %p689_p4 = scmp.lt.s32.totalorder %s680_s14, %s680_s14 }
  0x28   : > { %p683_p6 = pnand %p681_p5, %p669_p13  ;;  %p690_p8 = por %p689_p4, %p688_p7 }
  0x2a   : > { %p684_p10 = pneg %p683_p6 }
  0x2c   : > { %p691_p9 = pnand %p690_p8, %p684_p10 }
  0x2e   : > { %694 = shalt.err (!%p691_p9)
}
  0x2f   : > { %s785_s15 = smov 16   ;;  %s786_s16 = smov 1  }
  0x30   : > { %599 = dma.hbm_to_vmem [thread:$0]  (!%p867_p11), %s1032_s2, 128, %s108_s29, [#allocation10], %s785_s15, %s785_s15, %s786_s16  }
  0x31   : > { %p27_p12 = scmp.eq.s32.totalorder %s26_s6, 0  ;;  %p36_p13 = scmp.ne.s32.totalorder %s777_s24, %s773_s23 }
  0x32   : > { %p37_p4 = scmp.eq.s32.totalorder %s781_s25, 0  ;;  %p605_p7 = scmp.lt.s32.totalorder %s781_s25, 3 }
  0x33   : > { %s898_s19 = scalar_select %p27_p12, %s777_s24, %s29_s5  }
  0x34   : > { %p38_p8 = por %p37_p4, %p36_p13  ;;  %s121_s20 = sand.u32 1, %s777_s24  }
  0x35   : > { %s558_s21 = sshll.u32 %s121_s20, 6  ;;  %s575_s22 = sshll.u32 %s781_s25, 10 }
  0x36   : > { %s905_s8 = scalar_lea.hbm %s1031_s1, %s575_s22  ;;  %s125_s29 = scalar_lea.vmem [#allocation6], %s558_s21 }
  0x37   : > { %s133_s30 = sshll.u32 %s125_s29, 4  ;;  %p909_p9 = pnand %p605_p7, %p38_p8  ;;  %s907_s30 = int_to_ptr.vmem [resolvable:$true] %s133_s30 }
  0x38   : > { %s913_s25 = scalar_lea.sflag [#allocation7], %s121_s20  ;;  %s695_s6 = scalar_lea.hbm %s905_s8, 1024 }
  0x39   : > { %p696_p11 = scmp.ne.s32.totalorder %s905_s8, %s695_s6  ;;  %p697_p0 = pneg %p909_p9 }
  0x3a   : > { %s700_s11 = scalar_lea.hbm %s1031_s1, 3072  ;;  %p701_p3 = scmp.lt.u32.totalorder %s905_s8, %s1031_s1 }
  0x3b   : > { %p698_p1 = pnand %p697_p0, %p696_p11  ;;  %p702_p5 = scmp.lt.u32.totalorder %s700_s11, %s695_s6 }
  0x3c   : > { %p704_p10 = scmp.lt.u32.totalorder %s695_s6, %s905_s8 }
  0x3d   : > { %p699_p2 = pneg %p698_p1  ;;  %p703_p6 = por %p702_p5, %p701_p3 }
  0x3f   : > { %p705_p12 = por %p704_p10, %p703_p6 }
  0x41   : > { %p706_p13 = pnand %p705_p12, %p699_p2 }
  0x43   : > { %709 = shalt.err (!%p706_p13)
}
  0x44   : > { %s710_s14 = scalar_lea.vmem %s907_s30, 1024  ;;  %s787_s15 = smov [#allocation6]  }
  0x45   : > { %p711_p4 = scmp.ne.s32.totalorder %s907_s30, %s710_s14  ;;  %s715_s16 = sshll.u32 %s787_s15, 4  ;;  %s716_s16 = int_to_ptr.vmem [resolvable:$false] %s715_s16 }
  0x46   : > { %s717_s17 = scalar_lea.vmem %s716_s16, 2048  ;;  %p718_p11 = scmp.lt.s32.totalorder %s907_s30, %s716_s16 }
  0x47   : > { %p713_p7 = pnand %p711_p4, %p697_p0  ;;  %p719_p1 = scmp.lt.s32.totalorder %s717_s17, %s710_s14 }
  0x49   : > { %p714_p8 = pneg %p713_p7  ;;  %p720_p3 = por %p719_p1, %p718_p11 }
  0x4b   : > { %p721_p5 = pnand %p720_p3, %p714_p8 }
  0x4d   : > { %724 = shalt.err (!%p721_p5)
}
  0x4e   : > { %s788_s18 = smov 128   ;;  %s789_s20 = smov 8  }
  0x4f   : > { %603 = dma.hbm_to_vmem [thread:$0]  (!%p909_p9), %s905_s8, 1024, %s907_s30, %s913_s25, %s788_s18, %s788_s18, %s789_s20  }
  0x50   : > { %p1041_p0 = scmp.ne.s32.totalorder %s1038_s27, 0 }
  0x51   : > { %s147_s21 = sand.u32 (!%p1041_p0), 1, %s773_s23   ;;  %p1042_p2 = scmp.ne.s32.totalorder (!%p1041_p0), %s1037_s26, 0 }
  0x52   : > { %145 = sbr.rel (%p1041_p0) target bundleno = 874 (0x36a), region = 28  ;;  %s563_s22 = sshll.u32 (!%p1041_p0), %s147_s21, 6 }
  0x53   : > { %s148_s28 = scalar_lea.sflag (!%p1041_p0), [#allocation7], %s147_s21  ;;  %s944_s7 = scalar_lea.vmem (!%p1041_p0), [#allocation6], %s563_s22 }
  0x59   : > { %756 = dma.done.wait (%p1042_p2), %s148_s28, 1024  }
  0x5a   : > { %758 = vsyncadd (%p1042_p2), %s148_s28, 4294966272  ;;  %p1043_p6 = scmp.eq.s32.totalorder %s846_s0, 0 }
  0x5c   : > { %760 = dma.done.wait (%p1043_p6), [#allocation10], 128   ;;  %p1044_p9 = pmov %p1043_p6 }
  0x5d   : > { %p1045_p10 = scmp.ne.s32.totalorder %s846_s0, 0 }
  0x5e   : > { %762 = vsyncadd (%p1044_p9), [#allocation10], 4294967168  ;;  %v178_v0 = vld [vmem:[#allocation9] sm:$0x1] (!%p1045_p10)  ;;  %v179_v1 = vld [vmem:[#allocation9 + $0x1] sm:$0x1] (!%p1045_p10) }
  0x5f   : > { %175 = sbr.rel (%p1045_p10) target bundleno = 339 (0x153), region = 40  ;;  %vm186_vm0 = vcmask (!%p1045_p10), 253952   ;;  %s790_s27 = smov (!%p1045_p10), 0.0   ;;  %v180_v2 = vld [vmem:[#allocation9 + $0x2] sm:$0x1] (!%p1045_p10) }
  0x60   : > { %177 = sst [smem:[#allocation3]] (!%p1045_p10), %s790_s27  ;;  %v187_v3 = vsel (!%p1045_p10), %vm186_vm0, %v178_v0, 0.0  ;;  %v181_v4 = vld [vmem:[#allocation9 + $0x3] sm:$0x1] (!%p1045_p10)  ;;  %v188_v5 = vsel (!%p1045_p10), %vm186_vm0, %v179_v1, 0.0  ;;  %v190_v6 = vsel (!%p1045_p10), %vm186_vm0, %v180_v2, 0.0 }
  0x61   : > { %v182_v7 = vld [vmem:[#allocation9 + $0x4] sm:$0x1] (!%p1045_p10)  ;;  %v189_v8 = vadd.f32 (!%p1045_p10), %v188_v5, %v187_v3  ;;  %v192_v9 = vsel (!%p1045_p10), %vm186_vm0, %v181_v4, 0.0  ;;  %v183_v10 = vld [vmem:[#allocation9 + $0x5] sm:$0x1] (!%p1045_p10) }
  0x62   : > { %v194_v12 = vsel (!%p1045_p10), %vm186_vm0, %v182_v7, 0.0  ;;  %v184_v13 = vld [vmem:[#allocation9 + $0x6] sm:$0x1] (!%p1045_p10)  ;;  %v196_v15 = vsel (!%p1045_p10), %vm186_vm0, %v183_v10, 0.0  ;;  %v185_v16 = vld [vmem:[#allocation9 + $0x7] sm:$0x1] (!%p1045_p10) }
  0x63   : > { %v191_v11 = vadd.f32 (!%p1045_p10), %v190_v6, %v189_v8  ;;  %v198_v18 = vsel (!%p1045_p10), %vm186_vm0, %v184_v13, 0.0  ;;  %v200_v20 = vsel (!%p1045_p10), %vm186_vm0, %v185_v16, 0.0 }
  0x65   : > { %v193_v14 = vadd.f32 (!%p1045_p10), %v192_v9, %v191_v11 }
  0x67   : > { %v195_v17 = vadd.f32 %v194_v12, %v193_v14 }
  0x69   : > { %v197_v19 = vadd.f32 %v196_v15, %v195_v17 }
  0x6b   : > { %v199_v21 = vadd.f32 %v198_v18, %v197_v19 }
  0x6d   : > { %v201_v22 = vadd.f32 %v200_v20, %v199_v21 }
  0x6f   : > { %v203_v23 = vmul.f32 0.125, %v201_v22 }
  0x71   : > { %v204_v24 = vsub.f32 %v178_v0, %v203_v23  ;;  %v205_v25 = vsub.f32 %v179_v1, %v203_v23  ;;  %v206_v26 = vsub.f32 %v180_v2, %v203_v23  ;;  %v207_v27 = vsub.f32 %v181_v4, %v203_v23 }
  0x72   : > { %v208_v28 = vsub.f32 %v182_v7, %v203_v23  ;;  %v209_v29 = vsub.f32 %v183_v10, %v203_v23  ;;  %v210_v34 = vsub.f32 %v184_v13, %v203_v23  ;;  %v211_v40 = vsub.f32 %v185_v16, %v203_v23 }
  0x73   : > { %v212_v30 = vmul.f32 %v204_v24, %v204_v24  ;;  %v213_v31 = vmul.f32 %v205_v25, %v205_v25  ;;  %v214_v32 = vmul.f32 %v206_v26, %v206_v26  ;;  %v215_v33 = vmul.f32 %v207_v27, %v207_v27 }
  0x74   : > { %v216_v35 = vmul.f32 %v208_v28, %v208_v28  ;;  %v217_v41 = vmul.f32 %v209_v29, %v209_v29  ;;  %v218_v44 = vmul.f32 %v210_v34, %v210_v34  ;;  %v219_v47 = vmul.f32 %v211_v40, %v211_v40 }
  0x75   : > { %v220_v36 = vsel %vm186_vm0, %v212_v30, 0.0  ;;  %v221_v37 = vsel %vm186_vm0, %v213_v31, 0.0  ;;  %v223_v38 = vsel %vm186_vm0, %v214_v32, 0.0  ;;  %v225_v42 = vsel %vm186_vm0, %v215_v33, 0.0 }
  0x76   : > { %v222_v39 = vadd.f32 %v221_v37, %v220_v36  ;;  %v227_v45 = vsel %vm186_vm0, %v216_v35, 0.0  ;;  %v229_v48 = vsel %vm186_vm0, %v217_v41, 0.0  ;;  %v231_v50 = vsel %vm186_vm0, %v218_v44, 0.0 }
  0x77   : > { %v233_v52 = vsel %vm186_vm0, %v219_v47, 0.0 }
  0x78   : > { %v224_v43 = vadd.f32 %v223_v38, %v222_v39 }
  0x7a   : > { %v226_v46 = vadd.f32 %v225_v42, %v224_v43 }
  0x7c   : > { %v228_v49 = vadd.f32 %v227_v45, %v226_v46 }
  0x7e   : > { %v230_v51 = vadd.f32 %v229_v48, %v228_v49 }
  0x80   : > { %v232_v53 = vadd.f32 %v231_v50, %v230_v51 }
  0x82   : > { %v234_v54 = vadd.f32 %v233_v52, %v232_v53 }
  0x84   : > { %235 = vadd.xlane.f32.xlu0 %v234_v54 }
 0x111   : > { %v236_v55 = vpop.xlane.xlu0 %235 }
 0x112   : > { %v237_v56 = vrot.slane %v236_v55, 4 }
 0x114   : > { %v238_v57 = vadd.f32 %v237_v56, %v236_v55 }
 0x116   : > { %v239_v58 = vrot.slane %v238_v57, 2 }
 0x118   : > { %v240_v59 = vadd.f32 %v239_v58, %v238_v57 }
 0x11a   : > { %v241_v60 = vrot.slane %v240_v59, 1 }
 0x11c   : > { %v242_v61 = vadd.f32 %v241_v60, %v240_v59 }
 0x11e   : > { %576 = vpush %v242_v61 }
 0x14f   : > { %s577_s26 = spop %576 }
 0x150   : > { %s246_s8 = smul.f32 0.14285715, %s577_s26 }
 0x152   : > { %248 = sst [smem:[#allocation2]] %s246_s8 }
 0x153 PF: > { %v253_v62 = vld [vmem:[%s944_s7 + $0x20] sm:$0xff]  ;;  %v254_v0 = vld [vmem:[%s944_s7 + $0x28] sm:$0xff]  ;;  %v255_v2 = vld [vmem:[%s944_s7 + $0x30] sm:$0xff]  ;;  %s981_s29 = sshll.u32 %s846_s0, 1  ;;  %v791_v8 = vmov 0   ;;  %v337_v49 = vlaneseq  ;;  %vm348_vm1 = vcmask 130112  }
 0x154   : > { %v249_v63 = vld [vmem:[%s944_s7] sm:$0xff]  ;;  %265 = vadd.xlane.f32.xlu1 %v253_v62  ;;  %v250_v1 = vld [vmem:[%s944_s7 + $0x8] sm:$0xff]  ;;  %v251_v3 = vld [vmem:[%s944_s7 + $0x10] sm:$0xff]  ;;  %s286_s30 = sld [smem:[#allocation5 + %s981_s29]]  ;;  %s383_s5 = sadd.s32 1, %s981_s29  ;;  %653 = vset.pattern.permute.xlu0 %v791_v8  ;;  %vm355_vm2 = vcmask 195712  }
 0x155   : > { %257 = vadd.xlane.f32.xlu0 %v249_v63  ;;  %v256_v4 = vld [vmem:[%s944_s7 + $0x38] sm:$0xff]  ;;  %s384_s25 = sld [smem:[#allocation5 + %s383_s5]]  ;;  %654 = vset.pattern.permute.xlu1 %v791_v8  ;;  %v338_v50 = vand.u32 127, %v337_v49  ;;  %v340_v52 = vshrl.u32 %v337_v49, 7  ;;  %vm362_vm3 = vcmask 261312   ;;  %vm365_vm4 = vcmask 253952  }
 0x156   : > { %v252_v5 = vld [vmem:[%s944_s7 + $0x18] sm:$0xff]  ;;  %s281_s10 = sld [smem:[#allocation2]]  ;;  %s792_s14 = smov 1e-12  }
 0x157   : > { %v343_v53 = vadd.s32 4294967288, %v338_v50  ;;  %v350_v54 = vadd.s32 4294967280, %v338_v50  ;;  %v341_v58 = vsub.s32 %v338_v50, %v340_v52  ;;  %v357_v59 = vadd.s32 4294967272, %v338_v50  ;;  %s793_s16 = smov 1e+12   ;;  %p468_p12 = scmp.lt.s32.totalorder %s383_s5, 5 }
 0x158   : > { %267 = vadd.xlane.f32.xlu1 %v254_v0  ;;  %p379_p13 = scmp.lt.s32.totalorder %s981_s29, 5  ;;  %s472_s28 = sld [smem:[#allocation3]] }
 0x159   : > { %259 = vadd.xlane.f32.xlu0 %v250_v1  ;;  %v346_v57 = vsub.s32 %v343_v53, %v340_v52  ;;  %v353_v60 = vsub.s32 %v350_v54, %v340_v52  ;;  %v360_v1 = vsub.s32 %v357_v59, %v340_v52  ;;  %p607_p4 = scmp.eq.s32.totalorder %s846_s0, 2  ;;  %s725_s5 = scalar_lea.hbm %s1033_s3, 16 }
 0x15a   : > { %s287_s6 = scalar_lea.vmem [#allocation9], %s286_s30  ;;  %p726_p7 = scmp.ne.s32.totalorder %s1033_s3, %s725_s5 }
 0x15b   : > { %v567_v6 = vld [vmem:[%s287_s6] ss:$0 sm:$0xff]  ;;  %s385_s9 = scalar_lea.vmem [#allocation9], %s384_s25  ;;  %p731_p1 = scmp.lt.u32.totalorder %s725_s5, %s1033_s3 }
 0x15c   : > { %269 = vadd.xlane.f32.xlu1 %v255_v2  ;;  %v568_v7 = vld [vmem:[%s385_s9] ss:$0 sm:$0xff]  ;;  %p727_p8 = pnand %p726_p7, %p607_p4 }
 0x15d   : > { %261 = vadd.xlane.f32.xlu0 %v251_v3 }
 0x15e   : > { %p728_p11 = pneg %p727_p8 }
 0x160   : > { %271 = vadd.xlane.f32.xlu1 %v256_v4  ;;  %p733_p3 = pnand %p731_p1, %p728_p11 }
 0x161   : > { %263 = vadd.xlane.f32.xlu0 %v252_v5 }
 0x171   : > { %299 = vbcast.lane.b32.xlu1 %v567_v6, 264 }
 0x175   : > { %393 = vbcast.lane.b32.xlu1 %v568_v7, 256 }
 0x177   : > { %295 = vbcast.lane.b32.xlu0 %v567_v6, 256 }
 0x179   : > { %397 = vbcast.lane.b32.xlu1 %v568_v7, 264 }
 0x17b   : > { %303 = vbcast.lane.b32.xlu0 %v567_v6, 272 }
 0x17d   : > { %401 = vbcast.lane.b32.xlu1 %v568_v7, 272 }
 0x17f   : > { %307 = vbcast.lane.b32.xlu0 %v567_v6, 280 }
 0x181   : > { %405 = vbcast.lane.b32.xlu1 %v568_v7, 280 }
 0x1e1   : > { %v266_v9 = vpop.xlane.xlu1 %265 }
 0x1e2   : > { %v258_v10 = vpop.xlane.xlu0 %257  ;;  %v277_v23 = vmul.f32 0.01, %v266_v9 }
 0x1e3   : > { %v273_v17 = vmul.f32 0.01, %v258_v10 }
 0x1e5   : > { %v268_v11 = vpop.xlane.xlu1 %267 }
 0x1e6   : > { %v260_v12 = vpop.xlane.xlu0 %259  ;;  %v278_v30 = vmul.f32 0.01, %v268_v11 }
 0x1e7   : > { %v274_v18 = vmul.f32 0.01, %v260_v12 }
 0x1e9   : > { %v270_v13 = vpop.xlane.xlu1 %269 }
 0x1ea   : > { %v262_v14 = vpop.xlane.xlu0 %261  ;;  %v279_v37 = vmul.f32 0.01, %v270_v13 }
 0x1eb   : > { %v275_v28 = vmul.f32 0.01, %v262_v14 }
 0x1ed   : > { %v272_v15 = vpop.xlane.xlu1 %271 }
 0x1ee   : > { %v264_v16 = vpop.xlane.xlu0 %263  ;;  %v280_v43 = vmul.f32 0.01, %v272_v15 }
 0x1ef   : > { %v276_v35 = vmul.f32 0.01, %v264_v16 }
 0x1f1   : > { %v300_v19 = vpop.permute.xlu1 %299 }
 0x1f2   : > { %v296_v20 = vpop.permute.xlu0 %295  ;;  %v314_v21 = vsub.f32 %v274_v18, %v300_v19  ;;  %v282_v19 = vstv %s281_s10 }
 0x1f3   : > { %v313_v22 = vsub.f32 %v273_v17, %v296_v20  ;;  %655 = vrcp.f32 %v282_v19 }
 0x1f4   : > { %v318_v24 = vmul.f32 %v314_v21, %v314_v21 }
 0x1f5   : > { %v317_v25 = vmul.f32 %v313_v22, %v313_v22  ;;  %v394_v26 = vpop.permute.xlu1 %393 }
 0x1f6   : > { %v304_v27 = vpop.permute.xlu0 %303  ;;  %v411_v29 = vsub.f32 %v277_v23, %v394_v26  ;;  %329 = vperm.xlu1 %654, %v318_v24  }
 0x1f7   : > { %326 = vperm.xlu0 %653, %v317_v25   ;;  %v315_v32 = vsub.f32 %v275_v28, %v304_v27 }
 0x1f8   : > { %v415_v31 = vmul.f32 %v411_v29, %v411_v29 }
 0x1f9   : > { %v398_v33 = vpop.permute.xlu1 %397  ;;  %v319_v38 = vmul.f32 %v315_v32, %v315_v32 }
 0x1fa   : > { %v308_v34 = vpop.permute.xlu0 %307  ;;  %v412_v36 = vsub.f32 %v278_v30, %v398_v33  ;;  %424 = vperm.xlu1 %654, %v415_v31  }
 0x1fb   : > { %v316_v40 = vsub.f32 %v276_v35, %v308_v34 }
 0x1fc   : > { %v416_v39 = vmul.f32 %v412_v36, %v412_v36 }
 0x1fd   : > { %v402_v41 = vpop.permute.xlu1 %401  ;;  %v320_v44 = vmul.f32 %v316_v40, %v316_v40  ;;  %v656_v20 = vpop.eup %655 }
 0x1fe   : > { %v413_v42 = vsub.f32 %v279_v37, %v402_v41  ;;  %427 = vperm.xlu0 %653, %v416_v39   ;;  %332 = vperm.xlu1 %654, %v319_v38   ;;  %578 = vpush %v656_v20 }
 0x200   : > { %v417_v45 = vmul.f32 %v413_v42, %v413_v42 }
 0x201   : > { %v406_v46 = vpop.permute.xlu1 %405 }
 0x202   : > { %v414_v47 = vsub.f32 %v280_v43, %v406_v46  ;;  %430 = vperm.xlu0 %653, %v417_v45   ;;  %335 = vperm.xlu1 %654, %v320_v44  }
 0x204   : > { %v418_v48 = vmul.f32 %v414_v47, %v414_v47 }
 0x206   : > { %433 = vperm.xlu0 %653, %v418_v48  }
 0x22f   : > { %s579_s11 = spop %578 }
 0x275   : > { %v330_v51 = vpop.permute.xlu1 %329 }
 0x276   : > { %v327_v55 = vpop.permute.xlu0 %326  ;;  %v347_v63 = vrot.slane %v330_v51, %v346_v57 }
 0x277   : > { %v342_v0 = vrot.slane %v327_v55, %v341_v58 }
 0x279   : > { %v425_v56 = vpop.permute.xlu1 %424  ;;  %v349_v5 = vsel %vm348_vm1, %v347_v63, %v342_v0 }
 0x27a   : > { %v438_v10 = vrot.slane %v425_v56, %v341_v58 }
 0x27d   : > { %v333_v61 = vpop.permute.xlu1 %332  ;;  %v428_v62 = vpop.permute.xlu0 %427 }
 0x27e   : > { %v354_v2 = vrot.slane %v333_v61, %v353_v60  ;;  %v442_v6 = vrot.slane %v428_v62, %v346_v57 }
 0x280   : > { %v356_v9 = vsel %vm355_vm2, %v354_v2, %v349_v5  ;;  %v443_v14 = vsel %vm348_vm1, %v442_v6, %v438_v10 }
 0x281   : > { %v336_v3 = vpop.permute.xlu1 %335  ;;  %v431_v4 = vpop.permute.xlu0 %430 }
 0x282   : > { %v361_v7 = vrot.slane %v336_v3, %v360_v1  ;;  %v447_v8 = vrot.slane %v431_v4, %v353_v60 }
 0x284   : > { %v363_v11 = vsel %vm362_vm3, %v361_v7, %v356_v9  ;;  %v448_v16 = vsel %vm355_vm2, %v447_v8, %v443_v14 }
 0x285   : > { %v434_v12 = vpop.permute.xlu0 %433  ;;  %v366_v13 = vsel %vm365_vm4, %v363_v11, 0.0 }
 0x286   : > { %v452_v15 = vrot.slane %v434_v12, %v360_v1  ;;  %367 = vadd.xlane.f32.xlu1 %v366_v13 }
 0x288   : > { %v453_v17 = vsel %vm362_vm3, %v452_v15, %v448_v16 }
 0x289   : > { %v455_v18 = vsel %vm365_vm4, %v453_v17, 0.0 }
 0x28a   : > { %456 = vadd.xlane.f32.xlu0 %v455_v18 }
 0x313   : > { %v368_v21 = vpop.xlane.xlu1 %367 }
 0x314   : > { %v369_v22 = vrot.slane %v368_v21, 4 }
 0x316   : > { %v370_v23 = vadd.f32 %v369_v22, %v368_v21 }
 0x317   : > { %v457_v24 = vpop.xlane.xlu0 %456 }
 0x318   : > { %v371_v25 = vrot.slane %v370_v23, 2  ;;  %v458_v26 = vrot.slane %v457_v24, 4 }
 0x31a   : > { %v372_v27 = vadd.f32 %v371_v25, %v370_v23  ;;  %v459_v28 = vadd.f32 %v458_v26, %v457_v24 }
 0x31c   : > { %v460_v29 = vrot.slane %v459_v28, 2  ;;  %v373_v30 = vrot.slane %v372_v27, 1 }
 0x31e   : > { %v461_v31 = vadd.f32 %v460_v29, %v459_v28  ;;  %v374_v32 = vadd.f32 %v373_v30, %v372_v27 }
 0x320   : > { %580 = vpush %v374_v32  ;;  %v462_v33 = vrot.slane %v461_v31, 1 }
 0x322   : > { %v463_v34 = vadd.f32 %v462_v33, %v461_v31 }
 0x324   : > { %582 = vpush %v463_v34 }
 0x351   : > { %s581_s12 = spop %580 }
 0x352   : > { %s376_s13 = smul.f32 %s581_s12, %s579_s11 }
 0x354   : > { %s377_s15 = smax.f32 %s792_s14, %s376_s13 }
 0x355   : > { %s378_s17 = smin.f32 %s793_s16, %s377_s15  ;;  %s583_s18 = spop %582 }
 0x356   : > { %s465_s20 = smul.f32 %s583_s18, %s579_s11  ;;  %s380_s21 = sadd.f32 7e-12, %s378_s17 }
 0x358   : > { %s466_s22 = smax.f32 %s792_s14, %s465_s20  ;;  %s1051_s21 = smov (!%p379_p13, %s380_s21), 0.0 }
 0x359   : > { %s467_s7 = smin.f32 %s793_s16, %s466_s22 }
 0x35a   : > { %s469_s27 = sadd.f32 7e-12, %s467_s7 }
 0x35c   : > { %s1053_s27 = smov (!%p468_p12, %s469_s27), 0.0 }
 0x35d   : > { %s471_s26 = sadd.f32 %s1053_s27, %s1051_s21 }
 0x35f   : > { %s473_s8 = sadd.f32 %s472_s28, %s471_s26 }
 0x361   : > { %475 = sst [smem:[#allocation3]] %s473_s8  ;;  %s483_s30 = smul.f32 0.2, %s473_s8 }
 0x363   : > { %591 = sst [smem:[#allocation11]] (%p607_p4), %s483_s30 }
 0x364   : > { %736 = shalt.err (!%p733_p3)
}
 0x365   : > { %s794_s12 = smov [#allocation11]  }
 0x366   : > { %593 = dma.smem_to_hbm (%p607_p4), %s794_s12, 16, %s1033_s3, [#allocation8]  }
 0x367   : > { %764 = dma.done.wait (%p607_p4), [#allocation8], 16  }
 0x368   : > { %766 = vsyncadd (%p607_p4), [#allocation8], 4294967280 }
 0x369   : > { %499 = sfence }
 0x36a PF: > { %p19_p5 = scmp.ge.s32.totalorder %s872_s4, 5   ;;  %s1046_s22 = smov %s773_s23 }
 0x36b   : > { %s1047_s23 = smov %s777_s24  ;;  %s1048_s24 = smov %s898_s19 }
 0x36c   : > { %s1049_s25 = smov %s872_s4  ;;  %21 = sbr.rel (!%p19_p5) target bundleno = 17 (0x11), region = 83 }
 0x373   :  { %505 = vsyncpa [#allocation7], 1 }
 0x374   :  { %507 = vsyncpa [#allocation7 + $0x1], 1 }
 0x375   :  { %508 = vsyncpa [#allocation10], 1 }
 0x376   :  { %509 = vsyncpa [#allocation8], 1 }
 0x377   :  { %511 = vsyncpa [#allocation8 + $0x1], 1 }

</bundles_post_ra>
